<compile_context>
chip_gen: v5e
topology: v5e:2x2
jax: 0.10.0
libtpu: 0.0.40
codegen_flags: <defaults>
</compile_context>

<pallas_src>
import jax
import jax.numpy as jnp
from jax.experimental import pallas as pl
from jax.experimental.pallas import tpu as pltpu


def _branching_fused_kernel(x_ref, w1_ref, b1_ref, w2_ref, b2_ref, out_ref):
    """Single step: out = relu(x @ W1_all + b1_all) @ W2_blockdiag + b2_all.

    Shapes (for the example config NB=4, B=8, H=H2=32, O=8):
      x_ref   : (B, H)            = (8, 32)
      w1_ref  : (H, NB*H2)        = (32, 128)   branch W1s concatenated on cols
      b1_ref  : (1, NB*H2)        = (1, 128)
      w2_ref  : (NB*H2, NB*O)     = (128, 32)   block-diagonal of branch W2s
      b2_ref  : (1, NB*O)         = (1, 32)
      out_ref : (B, NB*O)         = (8, 32)     lane-dense fused output
    """
    x = x_ref[...]
    h = jnp.dot(x, w1_ref[...], preferred_element_type=jnp.float32) + b1_ref[...]
    h = jnp.maximum(h, 0.0)  # ReLU
    y = (
        jnp.dot(h.astype(w2_ref.dtype), w2_ref[...],
                preferred_element_type=jnp.float32)
        + b2_ref[...]
    )
    out_ref[...] = y.astype(out_ref.dtype)


def branching_forward(x, w1, b1, w2, b2):
    """Apply all branch heads to x.

    Args:
      x : (B, H) shared input features.
      w1: (NB, H, H2), b1: (NB, 1, H2)  first Linear of each branch.
      w2: (NB, H2, O), b2: (NB, 1, O)   second Linear of each branch.

    Returns:
      Python list of NB arrays of shape (B, O), matching the PyTorch module.
    """
    nb, H, H2 = w1.shape
    _, _, O = w2.shape
    B = x.shape[0]

    # --- layout plumbing (plain JAX, outside the kernel, essentially free) ---
    # Concatenate the per-branch first-layer weights along the output dim.
    w1_all = jnp.transpose(w1, (1, 0, 2)).reshape(H, nb * H2)   # (H, NB*H2)
    b1_all = b1.reshape(1, nb * H2)                             # (1, NB*H2)
    # Block-diagonalize the per-branch second-layer weights.
    w2_bd = jax.scipy.linalg.block_diag(*[w2[i] for i in range(nb)])  # (NB*H2, NB*O)
    w2_bd = w2_bd.astype(w2.dtype)
    b2_all = b2.reshape(1, nb * O)                              # (1, NB*O)

    out = pl.pallas_call(
        _branching_fused_kernel,
        out_shape=jax.ShapeDtypeStruct((B, nb * O), x.dtype),
        grid=(1,),
        in_specs=[
            pl.BlockSpec((B, H), lambda i: (0, 0)),               # x
            pl.BlockSpec((H, nb * H2), lambda i: (0, 0)),         # fused W1
            pl.BlockSpec((1, nb * H2), lambda i: (0, 0)),         # fused b1
            pl.BlockSpec((nb * H2, nb * O), lambda i: (0, 0)),    # block-diag W2
            pl.BlockSpec((1, nb * O), lambda i: (0, 0)),          # fused b2
        ],
        out_specs=pl.BlockSpec((B, nb * O), lambda i: (0, 0)),
        compiler_params=pltpu.CompilerParams(
            dimension_semantics=("arbitrary",),
        ),
    )(x, w1_all, b1_all, w2_bd, b2_all)

    # Match PyTorch semantics: return a Python list of per-branch outputs.
    return [out[:, i * O:(i + 1) * O] for i in range(nb)]


def _reference_forward(x, w1, b1, w2, b2):
    """Pure-JAX reference matching the PyTorch branch-list semantics."""
    outs = []
    for i in range(w1.shape[0]):
        h = jnp.maximum(x @ w1[i] + b1[i], 0.0)
        outs.append(h @ w2[i] + b2[i])
    return outs


if __name__ == "__main__":
    # Small shapes implied by the module (FC branch heads on flattened features).
    NB = 4      # number of branches
    B = 8       # batch
    H = 32      # input feature size
    H2 = 32     # branch hidden size
    O = 8       # branch output size (e.g. control dims)

    key = jax.random.PRNGKey(0)
    kx, kw1, kb1, kw2, kb2 = jax.random.split(key, 5)

    x = jax.random.normal(kx, (B, H), dtype=jnp.float32)
    w1 = jax.random.normal(kw1, (NB, H, H2), dtype=jnp.float32) * 0.1
    b1 = jax.random.normal(kb1, (NB, 1, H2), dtype=jnp.float32) * 0.1
    w2 = jax.random.normal(kw2, (NB, H2, O), dtype=jnp.float32) * 0.1
    b2 = jax.random.normal(kb2, (NB, 1, O), dtype=jnp.float32) * 0.1

    outs = branching_forward(x, w1, b1, w2, b2)
    outs = [jax.block_until_ready(o) for o in outs]

    refs = _reference_forward(x, w1, b1, w2, b2)
    for o, r in zip(outs, refs):
        assert o.shape == (B, O)
        assert jnp.allclose(o, r, atol=1e-4, rtol=1e-4)

    print("KERNEL_OK")
</pallas_src>

<mosaic_0001>
module attributes {stable_mosaic.version = 11 : i64} {
  func.func @_branching_fused_kernel(%arg0: i32, %arg1: memref<8x32xf32, #tpu.memory_space<vmem>>, %arg2: memref<32x128xf32, #tpu.memory_space<vmem>>, %arg3: memref<1x128xf32, #tpu.memory_space<vmem>>, %arg4: memref<128x32xf32, #tpu.memory_space<vmem>>, %arg5: memref<1x32xf32, #tpu.memory_space<vmem>>, %arg6: memref<8x32xf32, #tpu.memory_space<vmem>>) attributes {dimension_semantics = [#tpu.dimension_semantics<arbitrary>], iteration_bounds = array<i64: 1>, scalar_prefetch = 0 : i64, scratch_operands = 0 : i64, tpu.core_type = #tpu.core_type<tc>, window_params = [{pipeline_mode = #tpu.pipeline_mode<synchronous>, transform_indices = @transform_0, window_bounds = array<i64: 8, 32>}, {pipeline_mode = #tpu.pipeline_mode<synchronous>, transform_indices = @transform_1, window_bounds = array<i64: 32, 128>}, {pipeline_mode = #tpu.pipeline_mode<synchronous>, transform_indices = @transform_2, window_bounds = array<i64: 1, 128>}, {pipeline_mode = #tpu.pipeline_mode<synchronous>, transform_indices = @transform_3, window_bounds = array<i64: 128, 32>}, {pipeline_mode = #tpu.pipeline_mode<synchronous>, transform_indices = @transform_4, window_bounds = array<i64: 1, 32>}, {pipeline_mode = #tpu.pipeline_mode<synchronous>, transform_indices = @transform_5, window_bounds = array<i64: 8, 32>}]} {
    %c0 = arith.constant 0 : index
    %c0_0 = arith.constant 0 : index
    %0 = vector.load %arg1[%c0, %c0_0] : memref<8x32xf32, #tpu.memory_space<vmem>>, vector<8x32xf32>
    %c0_1 = arith.constant 0 : index
    %c0_2 = arith.constant 0 : index
    %1 = vector.load %arg2[%c0_1, %c0_2] : memref<32x128xf32, #tpu.memory_space<vmem>>, vector<32x128xf32>
    %cst = arith.constant dense<0.000000e+00> : vector<8x128xf32>
    %2 = tpu.matmul %0, %1, %cst {dimension_numbers = #tpu.dot_dimension_numbers<[1], [0], [0], [1], [0, 0, 1, 1], [], []>} : vector<8x32xf32>, vector<32x128xf32>, vector<8x128xf32> -> vector<8x128xf32>
    %c0_3 = arith.constant 0 : index
    %c0_4 = arith.constant 0 : index
    %3 = vector.load %arg3[%c0_3, %c0_4] : memref<1x128xf32, #tpu.memory_space<vmem>>, vector<1x128xf32>
    %4 = vector.broadcast %3 : vector<1x128xf32> to vector<8x128xf32>
    %5 = arith.addf %2, %4 : vector<8x128xf32>
    %cst_5 = arith.constant 0.000000e+00 : f32
    %6 = vector.broadcast %cst_5 : f32 to vector<8x128xf32>
    %7 = arith.maximumf %5, %6 : vector<8x128xf32>
    %c0_6 = arith.constant 0 : index
    %c0_7 = arith.constant 0 : index
    %8 = vector.load %arg4[%c0_6, %c0_7] : memref<128x32xf32, #tpu.memory_space<vmem>>, vector<128x32xf32>
    %cst_8 = arith.constant dense<0.000000e+00> : vector<8x32xf32>
    %9 = tpu.matmul %7, %8, %cst_8 {dimension_numbers = #tpu.dot_dimension_numbers<[1], [0], [0], [1], [0, 0, 1, 1], [], []>} : vector<8x128xf32>, vector<128x32xf32>, vector<8x32xf32> -> vector<8x32xf32>
    %c0_9 = arith.constant 0 : index
    %c0_10 = arith.constant 0 : index
    %10 = vector.load %arg5[%c0_9, %c0_10] : memref<1x32xf32, #tpu.memory_space<vmem>>, vector<1x32xf32>
    %11 = vector.broadcast %10 : vector<1x32xf32> to vector<8x32xf32>
    %12 = arith.addf %9, %11 : vector<8x32xf32>
    %c0_11 = arith.constant 0 : index
    %c0_12 = arith.constant 0 : index
    %13 = vector.load %arg6[%c0_11, %c0_12] : memref<8x32xf32, #tpu.memory_space<vmem>>, vector<8x32xf32>
    tpu.vector_store %arg6[%c0_11, %c0_12], %12 {strides = array<i32>} : memref<8x32xf32, #tpu.memory_space<vmem>>, vector<8x32xf32>,
    return
  }
  func.func @transform_0(%arg0: i32) -> (i32, i32) {
    %c0_i32 = arith.constant 0 : i32
    %c0_i32_0 = arith.constant 0 : i32
    %c0_i32_1 = arith.constant 0 : i32
    return %c0_i32, %c0_i32_0 : i32, i32
  }
  func.func @transform_1(%arg0: i32) -> (i32, i32) {
    %c0_i32 = arith.constant 0 : i32
    %c0_i32_0 = arith.constant 0 : i32
    %c0_i32_1 = arith.constant 0 : i32
    return %c0_i32, %c0_i32_0 : i32, i32
  }
  func.func @transform_2(%arg0: i32) -> (i32, i32) {
    %c0_i32 = arith.constant 0 : i32
    %c0_i32_0 = arith.constant 0 : i32
    %c0_i32_1 = arith.constant 0 : i32
    return %c0_i32, %c0_i32_0 : i32, i32
  }
  func.func @transform_3(%arg0: i32) -> (i32, i32) {
    %c0_i32 = arith.constant 0 : i32
    %c0_i32_0 = arith.constant 0 : i32
    %c0_i32_1 = arith.constant 0 : i32
    return %c0_i32, %c0_i32_0 : i32, i32
  }
  func.func @transform_4(%arg0: i32) -> (i32, i32) {
    %c0_i32 = arith.constant 0 : i32
    %c0_i32_0 = arith.constant 0 : i32
    %c0_i32_1 = arith.constant 0 : i32
    return %c0_i32, %c0_i32_0 : i32, i32
  }
  func.func @transform_5(%arg0: i32) -> (i32, i32) {
    %c0_i32 = arith.constant 0 : i32
    %c0_i32_0 = arith.constant 0 : i32
    %c0_i32_1 = arith.constant 0 : i32
    return %c0_i32, %c0_i32_0 : i32, i32
  }
}

</mosaic_0001>

<bundles_post_ra>
// kernel: tpu_custom_call.1
= control target key start
LH: loop header
LB: loop body
LE: loop exit
PB: predicated region body
PF: predicated region fallthrough
CT: control target
= control target key end

     0   :  { %vm30_vm0 = vcmask 261120   ;;  %s247_s0 = inlined_call_operand.vmem [shape: f32[8,32], index: 0, kind: input, shape index: {}]   ;;  %s248_s1 = inlined_call_operand.vmem [shape: f32[32,128], index: 1, kind: input, shape index: {}]   ;;  %s249_s2 = inlined_call_operand.vmem [shape: f32[1,128], index: 2, kind: input, shape index: {}]   ;;  %s250_s3 = inlined_call_operand.vmem [shape: f32[128,32], index: 3, kind: input, shape index: {}]   ;;  %s251_s4 = inlined_call_operand.vmem [shape: f32[1,32], index: 4, kind: input, shape index: {}]   ;;  %s252_s5 = inlined_call_operand.hbm [shape: f32[8,32], index: 5, kind: output, shape index: {}]  }
   0x1   :  { %v25_v0 = vld [vmem:[%s248_s1 + $0x18] sm:$0xff]  ;;  %v24_v1 = vld [vmem:[%s248_s1 + $0x10] sm:$0xff]  ;;  %v23_v3 = vld [vmem:[%s248_s1 + $0x8] sm:$0xff] }
   0x2   :  { %46 = vmatpush.msra.mxu0 %v25_v0  ;;  %v70_v2 = vld [vmem:[%s250_s3 + $0x78] sm:$0xff]  ;;  %v69_v4 = vld [vmem:[%s250_s3 + $0x70] sm:$0xff]  ;;  %v68_v5 = vld [vmem:[%s250_s3 + $0x68] sm:$0xff] }
   0x3   :  { %75 = vmatpush.msra.mxu1 %v70_v2  ;;  %v22_v6 = vld [vmem:[%s248_s1] sm:$0xff]  ;;  %v66_v9 = vld [vmem:[%s250_s3 + $0x58] sm:$0xff] }
   0x4   :  { %47 = vmatpush.msra.mxu0 %v24_v1  ;;  %v21_v7 = vld [vmem:[%s247_s0] sm:$0xff] }
   0x5   :  { %76 = vmatpush.msra.mxu1 %v69_v4  ;;  %v67_v8 = vld [vmem:[%s250_s3 + $0x60] sm:$0xff] }
   0x6   :  { %48 = vmatpush.msra.mxu0 %v23_v3 }
   0x7   :  { %77 = vmatpush.msra.mxu1 %v68_v5 }
   0x8   :  { %49 = vmatpush.msra.mxu0 %v22_v6 }
   0x9   :  { %10 = vsyncpa [#allocation3], 0  ;;  %112 = vmatmul.msk.f32.vlgmr.msra.gmra.mxu0 %vm30_vm0, %v21_v7  ;;  %78 = vmatpush.msra.mxu1 %v67_v8  ;;  %v65_v10 = vld [vmem:[%s250_s3 + $0x50] sm:$0xff]  ;;  %v64_v11 = vld [vmem:[%s250_s3 + $0x48] sm:$0xff]  ;;  %s142_s12 = smov [#allocation2]   ;;  %s103_s14 = sshll.u32 %s252_s5, 4  ;;  %s104_s14 = int_to_ptr.hbm [resolvable:$true] %s103_s14 }
   0xa   :  { %v63_v12 = vld [vmem:[%s250_s3 + $0x40] sm:$0xff]  ;;  %v62_v13 = vld [vmem:[%s250_s3 + $0x38] sm:$0xff]  ;;  %v61_v14 = vld [vmem:[%s250_s3 + $0x30] sm:$0xff]  ;;  %s101_s1 = sshll.u32 %s142_s12, 4  ;;  %s102_s1 = int_to_ptr.vmem [resolvable:$true] %s101_s1 }
   0xb   :  { %79 = vmatpush.msra.mxu1 %v66_v9  ;;  %v60_v15 = vld [vmem:[%s250_s3 + $0x28] sm:$0xff]  ;;  %v59_v16 = vld [vmem:[%s250_s3 + $0x20] sm:$0xff]  ;;  %v58_v17 = vld [vmem:[%s250_s3 + $0x18] sm:$0xff] }
   0xc   :  { %v57_v18 = vld [vmem:[%s250_s3 + $0x10] sm:$0xff]  ;;  %v56_v19 = vld [vmem:[%s250_s3 + $0x8] sm:$0xff]  ;;  %v55_v20 = vld [vmem:[%s250_s3] sm:$0xff] }
   0xd   :  { %80 = vmatpush.msra.mxu1 %v65_v10  ;;  %v114_v21 = vld [vmem:[%s249_s2] ss:$0 sm:$0xff] }
   0xe   :  { %v115_v25 = vld [vmem:[%s251_s4] ss:$0 sm:$0xff] }
   0xf   :  { %81 = vmatpush.msra.mxu1 %v64_v11 }
  0x11   :  { %82 = vmatpush.msra.mxu1 %v63_v12 }
  0x13   :  { %83 = vmatpush.msra.mxu1 %v62_v13 }
  0x15   :  { %84 = vmatpush.msra.mxu1 %v61_v14 }
  0x17   :  { %85 = vmatpush.msra.mxu1 %v60_v15 }
  0x19   :  { %86 = vmatpush.msra.mxu1 %v59_v16 }
  0x1b   :  { %87 = vmatpush.msra.mxu1 %v58_v17 }
  0x1d   :  { %88 = vmatpush.msra.mxu1 %v57_v18 }
  0x1f   :  { %89 = vmatpush.msra.mxu1 %v56_v19 }
  0x21   :  { %90 = vmatpush.msra.mxu1 %v55_v20 }
  0x86   :  { %v51_v22 = vpop.f32.mrf.mxu0 }
  0x87   :  { %v52_v23 = vadd.f32 %v114_v21, %v51_v22 }
  0x89   :  { %v54_v24 = vmax.f32 %v52_v23, 0.0 }
  0x8b   :  { %91 = vmatmul.f32.vlgmr.msra.gmra.mxu1 %v54_v24 }
 0x108   :  { %v92_v26 = vpop.f32.mrf.mxu1 }
 0x109   :  { %v93_v27 = vadd.f32 %v115_v25, %v92_v26 }
 0x10b   :  { %95 = vst.msk [vmem:[#allocation2] sm:$0xff] %vm30_vm0, %v93_v27 }
 0x10c   :  { %106 = dma.vmem_to_hbm [thread:$0]  %s102_s1, 128, %s104_s14, [#allocation3]  }
 0x10d   :  { %140 = dma.done.wait [#allocation3], 128  }
 0x10e   :  { %141 = vsyncadd [#allocation3], 4294967168 }
 0x10f   :  { %111 = vsyncpa [#allocation3], 1 }

</bundles_post_ra>
